<compile_context>
chip_gen: v7x
topology: tpu7x:2x2x1
jax: 0.10.0
libtpu: 0.0.40
codegen_flags: <defaults>
</compile_context>

<pallas_src>
import jax
import jax.numpy as jnp
from jax.experimental import pallas as pl
from jax.experimental.pallas import tpu as pltpu

LANES = 128                     # vreg lane width: last dim must be lane-dense
SUBLANES = 8                    # sublane granularity for f32
TILE_ROWS_MAX = 8192            # (8192, 128) f32 = 4 MiB tile; ~16 MiB with
                                # in+out double-buffered -> fits every gen
_MIN_PALLAS_ELEMS = 128 * 1024  # below ~512 KiB, XLA fusion beats kernel launch


def _round_up(x: int, m: int) -> int:
    return ((x + m - 1) // m) * m


def linear_kernel(w_ref, b_ref, x_ref, o_ref):
    # w_ref / b_ref: (1,) f32 scalar-prefetch refs in SMEM (read once per
    # step).  x_ref / o_ref: (tile_rows, 128) lane-dense VMEM tiles.
    # Single VPU FMA, one load + one store per vreg (matters on v5e's single
    # vst slot); no scratch, no MXU.
    o_ref[...] = x_ref[...] * w_ref[0] + b_ref[0]


def linear_regressor(x, w, b, *, min_pallas_elems=_MIN_PALLAS_ELEMS):
    """y = x @ W^T + b for nn.Linear(1, 1): W (1, 1), b (1,).  x: (N, 1) f32."""
    n = x.shape[0]
    w1d = jnp.asarray(w, jnp.float32).reshape(1)
    b1d = jnp.asarray(b, jnp.float32).reshape(1)

    # Tiny-N fallback: pallas_call fixed launch/pipeline overhead dwarfs a
    # vreg or two of work; plain fused XLA is strictly faster there.
    if n < min_pallas_elems:
        return (x.astype(jnp.float32) * w1d[0] + b1d[0]).reshape(n, 1)

    # Lane-dense view: reinterpret the contiguous (N, 1) buffer row-major as
    # (rows, 128) so every vreg / vector store is fully populated.  Pad only
    # to the next (8, 128) footprint (<= ~4.5 KiB), NOT to a full tile.
    rows = pl.cdiv(n, LANES)
    rows_padded = _round_up(rows, SUBLANES)
    padded_n = rows_padded * LANES

    x_flat = x.reshape(-1).astype(jnp.float32)
    if padded_n != n:
        x_flat = jnp.pad(x_flat, (0, padded_n - n))
    x2d = x_flat.reshape(rows_padded, LANES)

    # Tile choice: as big as TILE_ROWS_MAX, but guarantee >= 2 grid blocks
    # whenever there is more than one vreg-row of work (v7x megacore).
    tile_rows = min(TILE_ROWS_MAX, _round_up(pl.cdiv(rows_padded, 2), SUBLANES))
    grid = (pl.cdiv(rows_padded, tile_rows),)  # last block may be partial (OK: elementwise)

    y2d = pl.pallas_call(
        linear_kernel,
        out_shape=jax.ShapeDtypeStruct((rows_padded, LANES), jnp.float32),
        grid_spec=pltpu.PrefetchScalarGridSpec(
            num_scalar_prefetch=2,   # w, b land in SMEM before the grid runs
            grid=grid,
            in_specs=[
                pl.BlockSpec((tile_rows, LANES), lambda i, w_s, b_s: (i, 0)),
            ],
            out_specs=pl.BlockSpec((tile_rows, LANES), lambda i, w_s, b_s: (i, 0)),
        ),
        compiler_params=pltpu.CompilerParams(
            # Independent row-tiles: shard grid across the 2 TCs on v7x.
            dimension_semantics=("parallel",),
            # 4 MiB tiles * (in + out) * double-buffer = ~16 MiB: fits the
            # 32 MiB scoped budget on v7x and leaves headroom everywhere.
            vmem_limit_bytes=32 * 1024 * 1024,
        ),
        cost_estimate=pl.CostEstimate(
            flops=2 * padded_n,
            transcendentals=0,
            bytes_accessed=8 * padded_n,  # read 4B + write 4B per element
        ),
    )(w1d, b1d, x2d)

    if padded_n != n:
        return y2d.reshape(padded_n)[:n].reshape(n, 1)
    return y2d.reshape(n, 1)


if __name__ == "__main__":
    key = jax.random.PRNGKey(0)
    kx, kw, kb, kx2, kx3 = jax.random.split(key, 5)

    # Parameters consistent with nn.Linear(1, 1).
    w = jax.random.uniform(kw, (1, 1), jnp.float32, -1.0, 1.0)
    b = jax.random.uniform(kb, (1,), jnp.float32, -1.0, 1.0)

    # 1) Tiny batch (N=8): exercises the jnp fallback path.
    x_small = jax.random.normal(kx, (8, 1), dtype=jnp.float32)
    y_small = jax.block_until_ready(linear_regressor(x_small, w, b))
    assert y_small.shape == (8, 1)
    assert jnp.allclose(y_small, x_small @ w.T + b, atol=1e-6), "mismatch (N=8)"

    # 2) Pallas path, single-block grid (N=300 -> rows=3, padded to 8 rows).
    x_mid = jax.random.normal(kx2, (300, 1), dtype=jnp.float32)
    y_mid = jax.block_until_ready(
        linear_regressor(x_mid, w, b, min_pallas_elems=0))
    assert y_mid.shape == (300, 1)
    assert jnp.allclose(y_mid, x_mid @ w.T + b, atol=1e-6), "mismatch (N=300)"

    # 3) Pallas path, 2-block grid with a partial last block
    #    (N=2500 -> rows=20 -> padded 24 rows, tile_rows=16, grid=2).
    x_big = jax.random.normal(kx3, (2500, 1), dtype=jnp.float32)
    y_big = jax.block_until_ready(
        linear_regressor(x_big, w, b, min_pallas_elems=0))
    assert y_big.shape == (2500, 1)
    assert jnp.allclose(y_big, x_big @ w.T + b, atol=1e-6), "mismatch (N=2500)"

    print("KERNEL_OK")
</pallas_src>

<mosaic_0001>
module attributes {stable_mosaic.version = 11 : i64} {
  func.func @linear_kernel(%arg0: i32, %arg1: memref<1xf32, #tpu.memory_space<smem>>, %arg2: memref<1xf32, #tpu.memory_space<smem>>, %arg3: memref<8x128xf32, #tpu.memory_space<vmem>>, %arg4: memref<8x128xf32, #tpu.memory_space<vmem>>) attributes {dimension_semantics = [#tpu.dimension_semantics<parallel>], iteration_bounds = array<i64: 1>, scalar_prefetch = 2 : i64, scratch_operands = 0 : i64, tpu.core_type = #tpu.core_type<tc>, window_params = [{transform_indices = @transform_0, window_bounds = array<i64: 8, 128>}, {transform_indices = @transform_1, window_bounds = array<i64: 8, 128>}]} {
    %c0 = arith.constant 0 : index
    %c0_0 = arith.constant 0 : index
    %0 = vector.load %arg3[%c0, %c0_0] : memref<8x128xf32, #tpu.memory_space<vmem>>, vector<8x128xf32>
    %c0_1 = arith.constant 0 : index
    %1 = memref.load %arg1[%c0_1] : memref<1xf32, #tpu.memory_space<smem>>
    %2 = vector.broadcast %1 : f32 to vector<8x128xf32>
    %3 = arith.mulf %0, %2 : vector<8x128xf32>
    %c0_2 = arith.constant 0 : index
    %4 = memref.load %arg2[%c0_2] : memref<1xf32, #tpu.memory_space<smem>>
    %5 = vector.broadcast %4 : f32 to vector<8x128xf32>
    %6 = arith.addf %3, %5 : vector<8x128xf32>
    %c0_3 = arith.constant 0 : index
    %c0_4 = arith.constant 0 : index
    %7 = vector.load %arg4[%c0_3, %c0_4] : memref<8x128xf32, #tpu.memory_space<vmem>>, vector<8x128xf32>
    tpu.vector_store %arg4[%c0_3, %c0_4], %6 {strides = array<i32>} : memref<8x128xf32, #tpu.memory_space<vmem>>, vector<8x128xf32>,
    return
  }
  func.func @transform_0(%arg0: i32, %arg1: memref<1xf32, #tpu.memory_space<smem>>, %arg2: memref<1xf32, #tpu.memory_space<smem>>) -> (i32, i32) {
    %c0_i32 = arith.constant 0 : i32
    %c0_i32_0 = arith.constant 0 : i32
    return %arg0, %c0_i32 : i32, i32
  }
  func.func @transform_1(%arg0: i32, %arg1: memref<1xf32, #tpu.memory_space<smem>>, %arg2: memref<1xf32, #tpu.memory_space<smem>>) -> (i32, i32) {
    %c0_i32 = arith.constant 0 : i32
    %c0_i32_0 = arith.constant 0 : i32
    return %arg0, %c0_i32 : i32, i32
  }
}

</mosaic_0001>

<bundles_post_ra>
// kernel: tpu_custom_call.1
= control target key start
LH: loop header
LB: loop body
LE: loop exit
PB: predicated region body
PF: predicated region fallthrough
CT: control target
= control target key end

     0   :  { %10 = vsyncpa [#allocation6], 0  ;;  %s150_s0 = inlined_call_operand.<no memory space> [shape: f32[1], index: 0, kind: input, shape index: {}]   ;;  %s151_s1 = inlined_call_operand.<no memory space> [shape: f32[1], index: 1, kind: input, shape index: {}]   ;;  %s152_s2 = inlined_call_operand.hbm [shape: f32[8,128], index: 2, kind: input, shape index: {}]   ;;  %s153_s3 = inlined_call_operand.hbm [shape: f32[8,128], index: 3, kind: output, shape index: {}]  }
   0x1   :  { %11 = vsyncpa [#allocation7], 0  ;;  %s98_s12 = smov [#allocation5]   ;;  %s50_s16 = scalar_lea.hbm %s152_s2, 128 }
   0x2   :  { %s18_s13 = sshll.u32 %s98_s12, 4  ;;  %p51_p0 = scmp.ne.s32.totalorder %s152_s2, %s50_s16  ;;  %s19_s13 = int_to_ptr.vmem [resolvable:$true] %s18_s13 }
   0x3   :  { %p54_p1 = scmp.lt.u32.totalorder %s50_s16, %s152_s2 }
   0x5   :  { %p56_p2 = pnand %p54_p1, %p51_p0 }
   0x7   :  { %59 = shalt.err (!%p56_p2)
}
   0x8   :  { %s60_s21 = scalar_lea.vmem %s19_s13, 128  ;;  %p65_p4 = scmp.lt.s32.totalorder %s19_s13, %s19_s13 }
   0x9   :  { %p61_p3 = scmp.ne.s32.totalorder %s19_s13, %s60_s21  ;;  %p66_p5 = scmp.lt.s32.totalorder %s60_s21, %s60_s21 }
   0xb   :  { %p67_p6 = por %p66_p5, %p65_p4 }
   0xd   :  { %p68_p7 = pnand %p67_p6, %p61_p3 }
   0xf   :  { %71 = shalt.err (!%p68_p7)
}
  0x10   :  { %21 = dma.hbm_to_vmem [thread:$0]  %s152_s2, 128, %s19_s13, [#allocation6]  }
  0x11   :  { %94 = dma.done.wait [#allocation6], 128  }
  0x12   :  { %95 = vsyncadd [#allocation6], 4294967168  ;;  %v27_v0 = vstv %s150_s0  ;;  %v25_v1 = vld [vmem:[#allocation5] sm:$0xff]  ;;  %v30_v2 = vstv %s151_s1  ;;  %s99_s28 = smov [#allocation8]  }
  0x13   :  { %s39_s29 = sshll.u32 %s99_s28, 4  ;;  %v28_v3 = vmul.f32 %v27_v0, %v25_v1  ;;  %s40_s29 = int_to_ptr.vmem [resolvable:$true] %s39_s29 }
  0x14   :  { %s72_s30 = scalar_lea.vmem %s40_s29, 128  ;;  %p77_p9 = scmp.lt.s32.totalorder %s40_s29, %s40_s29 }
  0x15   :  { %v31_v4 = vadd.f32 %v30_v2, %v28_v3  ;;  %p73_p8 = scmp.ne.s32.totalorder %s40_s29, %s72_s30  ;;  %p78_p10 = scmp.lt.s32.totalorder %s72_s30, %s72_s30 }
  0x17   :  { %32 = vst [vmem:[#allocation8] sm:$0xff] %v31_v4  ;;  %p79_p11 = por %p78_p10, %p77_p9 }
  0x19   :  { %p80_p12 = pnand %p79_p11, %p73_p8 }
  0x1b   :  { %83 = shalt.err (!%p80_p12)
}
  0x1c   :  { %s84_s4 = scalar_lea.hbm %s153_s3, 128 }
  0x1d   :  { %p85_p13 = scmp.ne.s32.totalorder %s153_s3, %s84_s4  ;;  %p88_p0 = scmp.lt.u32.totalorder %s84_s4, %s153_s3 }
  0x1f   :  { %p90_p1 = pnand %p88_p0, %p85_p13 }
  0x21   :  { %93 = shalt.err (!%p90_p1)
}
  0x22   :  { %42 = dma.vmem_to_hbm [thread:$0]  %s40_s29, 128, %s153_s3, [#allocation7]  }
  0x23   :  { %96 = dma.done.wait [#allocation7], 128  }
  0x24   :  { %97 = vsyncadd [#allocation7], 4294967168 }
  0x25   :  { %46 = vsyncpa [#allocation6], 1 }
  0x26   :  { %47 = vsyncpa [#allocation7], 1 }

</bundles_post_ra>
